<compile_context>
chip_gen: v6e
topology: v6e:2x2x1
jax: 0.10.0
libtpu: 0.0.40
codegen_flags: <defaults>
</compile_context>

<pallas_src>
import jax
import jax.numpy as jnp
from jax.experimental import pallas as pl
from jax.experimental.pallas import tpu as pltpu


def _cdiv(a, b):
    return (a + b - 1) // b


def _round_up(x, m):
    return _cdiv(x, m) * m


def _feature_dropout_kernel(x_ref, keep_ref, o_ref):
    # x_ref: (tile_r, tile_s); keep_ref: (tile_r, 1) f32 in {0., 1.}.
    # where-select (not x*mask) so dropped rows are exactly zero even if the
    # input contains NaN/Inf.  One VPU select per vreg -- nowhere near the
    # bottleneck (HBM bandwidth is).
    o_ref[...] = jnp.where(keep_ref[...] > 0.5, x_ref[...],
                           jnp.zeros((), dtype=o_ref.dtype))


def random_dropout(x, key, p=0.5, training=True, *, min_pallas_bytes=1 << 20):
    """JAX/Pallas equivalent of RandomDropout.forward.

    theta ~ Uniform(0, p); each (batch, channel) feature map is zeroed with
    probability theta (feature dropout), WITHOUT the 1/(1-theta) rescaling.
    Identity when not training.
    """
    if not training:
        return x

    B, C, H, W = x.shape
    k_theta, k_mask = jax.random.split(key)

    # theta = torch.Tensor(1).uniform_(0, p)[0]
    theta = jax.random.uniform(k_theta, (), minval=0.0, maxval=p, dtype=jnp.float32)

    # Per-(batch, channel) keep mask (feature dropout drops whole channels).
    keep = (jax.random.uniform(k_mask, (B * C, 1), dtype=jnp.float32) >= theta)
    keep = keep.astype(jnp.float32)

    R, S = B * C, H * W
    x2 = x.reshape(R, S)
    itemsize = jnp.dtype(x.dtype).itemsize

    # Tiny tensors: kernel launch + pipeline prologue dwarfs the copy time;
    # a plain fused XLA select is strictly faster.
    if R * S * itemsize < min_pallas_bytes:
        out2 = jnp.where(keep > 0.5, x2, jnp.zeros((), dtype=x.dtype))
        return out2.reshape(B, C, H, W)

    # ---------------- tiling (pure HBM-bandwidth-bound op) ----------------
    # No jnp.pad / output slice: those are extra full HBM passes.  Instead the
    # grid uses cdiv tiling; trailing partial blocks get masked stores and
    # garbage reads in the OOB region, which is harmless (never written back).
    LANE = 128
    # Sub-32-bit dtypes pack along sublanes: 8 rows/vreg for 4B, 16 for 2B, 32 for 1B.
    row_align = {4: 8, 2: 16, 1: 32}.get(itemsize, 8)

    # ~4 MiB blocks: double-buffered in+out streams ~16 MiB VMEM -> safe on
    # v7x (64 MiB physical, binding constraint) and trivially on v5e/v6e,
    # while keeping the ~0.35 us per-grid-step overhead negligible.
    target_block_bytes = 4 * 1024 * 1024

    if S * row_align * itemsize <= target_block_bytes:
        # Full flattened rows: one long contiguous DMA per block (no 512 B
        # strided-segment pathology), last block dim == full array dim so the
        # (8,128) rule is satisfied without any padding.
        tile_s = S
        tile_r = (target_block_bytes // (tile_s * itemsize)) // row_align * row_align
        tile_r = max(row_align, tile_r)
    else:
        # Extremely wide rows: chunk the lane axis in 128-multiples (cdiv grid
        # handles the trailing partial lane block).
        tile_s = max(LANE, (target_block_bytes // (row_align * itemsize)) // LANE * LANE)
        tile_r = row_align

    # Megacore (v7x has 2 TCs): aim for >=4 row blocks so ("parallel", ...)
    # has something to shard.  Harmless on v5e/v6e.
    cap = _round_up(_cdiv(R, 4), row_align)
    tile_r = max(row_align, min(tile_r, cap))
    if tile_r >= R:
        tile_r = R  # exact full-dim block; no masking on the row axis at all.

    grid = (_cdiv(R, tile_r), _cdiv(S, tile_s))

    out2 = pl.pallas_call(
        _feature_dropout_kernel,
        out_shape=jax.ShapeDtypeStruct((R, S), x.dtype),
        grid_spec=pltpu.PrefetchScalarGridSpec(
            num_scalar_prefetch=0,
            grid=grid,
            in_specs=[
                pl.BlockSpec((tile_r, tile_s), lambda i, j: (i, j)),
                # Mask block index is constant along the inner (lane) grid axis,
                # so Pallas fetches it once per row block, not once per step.
                pl.BlockSpec((tile_r, 1), lambda i, j: (i, 0)),
            ],
            out_specs=pl.BlockSpec((tile_r, tile_s), lambda i, j: (i, j)),
        ),
        compiler_params=pltpu.CompilerParams(
            # Both axes independent -> megacore sharding on v7x.
            dimension_semantics=("parallel", "parallel"),
            # Explicit scoped-VMEM budget (raises v5e's 16 MiB default); 4 MiB
            # blocks double-buffered in+out stay well under this, and it is
            # within v7x's 64 MiB physical VMEM.
            vmem_limit_bytes=40 * 1024 * 1024,
        ),
        # NOTE: input_output_aliases intentionally omitted: x2 aliases the
        # caller's buffer, which may be reused afterwards.
    )(x2, keep)

    return out2.reshape(B, C, H, W)


if __name__ == "__main__":
    key = jax.random.PRNGKey(0)
    k_in, k_drop = jax.random.split(key)

    # Small NCHW input consistent with a point-feature tensor.
    B, C, H, W = 2, 4, 16, 16
    x = jax.random.normal(k_in, (B, C, H, W), dtype=jnp.float32)

    # Force the Pallas path (the demo tensor is below the tiny-tensor threshold).
    y = random_dropout(x, k_drop, p=0.5, training=True, min_pallas_bytes=0)
    y = jax.block_until_ready(y)
    assert y.shape == x.shape and y.dtype == x.dtype

    # Sanity: each (b, c) feature map is either identical to input or all zeros.
    yf = y.reshape(B * C, H * W)
    xf = x.reshape(B * C, H * W)
    kept_rows = jnp.all(yf == xf, axis=1)
    zero_rows = jnp.all(yf == 0.0, axis=1)
    assert bool(jnp.all(kept_rows | zero_rows)), "feature dropout mask not per-channel"

    # Pallas path matches the plain-XLA fallback bit-for-bit (same key => same mask).
    y_ref = random_dropout(x, k_drop, p=0.5, training=True, min_pallas_bytes=1 << 60)
    assert bool(jnp.all(y == y_ref))

    # Exercise the un-padded partial-block path: rows not a multiple of 8 and
    # flattened spatial dim (100) not a multiple of 128.
    x_odd = jax.random.normal(k_in, (2, 3, 10, 10), dtype=jnp.float32)
    y_odd = random_dropout(x_odd, k_drop, p=0.5, training=True, min_pallas_bytes=0)
    y_odd = jax.block_until_ready(y_odd)
    y_odd_ref = random_dropout(x_odd, k_drop, p=0.5, training=True,
                               min_pallas_bytes=1 << 60)
    assert y_odd.shape == x_odd.shape and y_odd.dtype == x_odd.dtype
    assert bool(jnp.all(y_odd == y_odd_ref))

    # Larger shape exercising multiple row blocks (megacore path) with a
    # non-128-multiple spatial size (56*56 = 3136).
    x_big = jax.random.normal(k_in, (4, 32, 56, 56), dtype=jnp.float32)
    y_big = random_dropout(x_big, k_drop, p=0.5, training=True, min_pallas_bytes=0)
    y_big = jax.block_until_ready(y_big)
    y_big_ref = random_dropout(x_big, k_drop, p=0.5, training=True,
                               min_pallas_bytes=1 << 60)
    assert bool(jnp.all(y_big == y_big_ref))

    # Eval mode is identity.
    y_eval = random_dropout(x, k_drop, p=0.5, training=False)
    assert bool(jnp.all(y_eval == x))

    print("KERNEL_OK")
</pallas_src>

<mosaic_0001>
module attributes {stable_mosaic.version = 11 : i64} {
  func.func @_feature_dropout_kernel(%arg0: i32, %arg1: i32, %arg2: memref<8x256xf32, #tpu.memory_space<vmem>>, %arg3: memref<8x1xf32, #tpu.memory_space<vmem>>, %arg4: memref<8x256xf32, #tpu.memory_space<vmem>>) attributes {dimension_semantics = [#tpu.dimension_semantics<parallel>, #tpu.dimension_semantics<parallel>], iteration_bounds = array<i64: 1, 1>, scalar_prefetch = 0 : i64, scratch_operands = 0 : i64, tpu.core_type = #tpu.core_type<tc>, window_params = [{transform_indices = @transform_0, window_bounds = array<i64: 8, 256>}, {transform_indices = @transform_1, window_bounds = array<i64: 8, 1>}, {transform_indices = @transform_2, window_bounds = array<i64: 8, 256>}]} {
    %c0 = arith.constant 0 : index
    %c0_0 = arith.constant 0 : index
    %0 = vector.load %arg3[%c0, %c0_0] : memref<8x1xf32, #tpu.memory_space<vmem>>, vector<8x1xf32>
    %cst = arith.constant 5.000000e-01 : f32
    %1 = vector.broadcast %cst : f32 to vector<8x1xf32>
    %2 = arith.cmpf ogt, %0, %1 : vector<8x1xf32>
    %c0_1 = arith.constant 0 : index
    %c0_2 = arith.constant 0 : index
    %3 = vector.load %arg2[%c0_1, %c0_2] : memref<8x256xf32, #tpu.memory_space<vmem>>, vector<8x256xf32>
    %cst_3 = arith.constant 0.000000e+00 : f32
    %4 = vector.shape_cast %2 : vector<8x1xi1> to vector<8x1xi1>
    %5 = vector.broadcast %4 : vector<8x1xi1> to vector<8x256xi1>
    %6 = vector.broadcast %cst_3 : f32 to vector<8x256xf32>
    %7 = arith.select %5, %3, %6 : vector<8x256xi1>, vector<8x256xf32>
    %c0_4 = arith.constant 0 : index
    %c0_5 = arith.constant 0 : index
    %8 = vector.load %arg4[%c0_4, %c0_5] : memref<8x256xf32, #tpu.memory_space<vmem>>, vector<8x256xf32>
    tpu.vector_store %arg4[%c0_4, %c0_5], %7 {strides = array<i32>} : memref<8x256xf32, #tpu.memory_space<vmem>>, vector<8x256xf32>,
    return
  }
  func.func @transform_0(%arg0: i32, %arg1: i32) -> (i32, i32) {
    %c0_i32 = arith.constant 0 : i32
    return %arg0, %arg1 : i32, i32
  }
  func.func @transform_1(%arg0: i32, %arg1: i32) -> (i32, i32) {
    %c0_i32 = arith.constant 0 : i32
    %c0_i32_0 = arith.constant 0 : i32
    return %arg0, %c0_i32 : i32, i32
  }
  func.func @transform_2(%arg0: i32, %arg1: i32) -> (i32, i32) {
    %c0_i32 = arith.constant 0 : i32
    return %arg0, %arg1 : i32, i32
  }
}

</mosaic_0001>

<bundles_post_ra>
// kernel: tpu_custom_call.1
= control target key start
LH: loop header
LB: loop body
LE: loop exit
PB: predicated region body
PF: predicated region fallthrough
CT: control target
= control target key end

     0   :  { %7 = vsyncpa [#allocation3], 0  ;;  %s127_s0 = inlined_call_operand.hbm [shape: f32[8,256], index: 0, kind: input, shape index: {}]   ;;  %s128_s1 = inlined_call_operand.vmem [shape: f32[8,1], index: 1, kind: input, shape index: {}]   ;;  %s129_s2 = inlined_call_operand.hbm [shape: f32[8,256], index: 2, kind: output, shape index: {}]  }
   0x1   :  { %8 = vsyncpa [#allocation4], 0  ;;  %s100_s9 = smov [#allocation2]  }
   0x2   :  { %s15_s10 = sshll.u32 %s100_s9, 4  ;;  %s16_s10 = int_to_ptr.vmem [resolvable:$true] %s15_s10 }
   0x3   :  { %s64_s11 = scalar_lea.vmem %s16_s10, 256  ;;  %p69_p1 = scmp.lt.s32.totalorder %s16_s10, %s16_s10 }
   0x4   :  { %p65_p0 = scmp.ne.s32.totalorder %s16_s10, %s64_s11  ;;  %p70_p2 = scmp.lt.s32.totalorder %s64_s11, %s64_s11 }
   0x6   :  { %p71_p3 = por %p70_p2, %p69_p1 }
   0x8   :  { %p72_p4 = pnand %p71_p3, %p65_p0 }
   0xa   :  { %75 = shalt.err (!%p72_p4)
}
   0xb   :  { %18 = dma.hbm_to_vmem [thread:$0]  %s127_s0, 256, %s16_s10, [#allocation3]  }
   0xc   :  { %96 = dma.done.wait [#allocation3], 256  }
   0xd   :  { %97 = vsyncadd [#allocation3], 4294967040  ;;  %v101_v0 = vmov 0   ;;  %v24_v1 = vld [vmem:[%s128_s1] sm:$0xff]  ;;  %s102_s16 = smov [#allocation5]   ;;  %v27_v4 = vld [vmem:[#allocation2 + $0x8] sm:$0xff] }
   0xe   :  { %55 = vset.pattern.permute.xlu0 %v101_v0  ;;  %vm25_vm0 = vcmp.gt.f32.partialorder %v24_v1, 0.5  ;;  %s43_s17 = sshll.u32 %s102_s16, 4  ;;  %v26_v3 = vld [vmem:[#allocation2] sm:$0xff]  ;;  %s44_s17 = int_to_ptr.vmem [resolvable:$true] %s43_s17 }
   0xf   :  { %v28_v2 = vsel %vm25_vm0, 1, %v101_v0  ;;  %s76_s0 = scalar_lea.vmem %s44_s17, 256  ;;  %p81_p6 = scmp.lt.s32.totalorder %s44_s17, %s44_s17 }
  0x10   :  { %30 = vperm.xlu0 %55, %v28_v2   ;;  %p77_p5 = scmp.ne.s32.totalorder %s44_s17, %s76_s0  ;;  %p82_p7 = scmp.lt.s32.totalorder %s76_s0, %s76_s0 }
  0x12   :  { %p83_p8 = por %p82_p7, %p81_p6 }
  0x14   :  { %p84_p9 = pnand %p83_p8, %p77_p5 }
  0x8b   :  { %v31_v5 = vpop.permute.xlu0 %30 }
  0x8c   :  { %vm32_vm1 = vcmp.eq.s32.totalorder %v31_v5, 1 }
  0x8d   :  { %v33_v6 = vsel %vm32_vm1, %v26_v3, 0.0  ;;  %v34_v7 = vsel %vm32_vm1, %v27_v4, 0.0 }
  0x8e   :  { %35 = vst [vmem:[#allocation5] sm:$0xff] %v33_v6  ;;  %36 = vst [vmem:[#allocation5 + $0x8] sm:$0xff] %v34_v7 }
  0x8f   :  { %87 = shalt.err (!%p84_p9)
}
  0x90   :  { %46 = dma.vmem_to_hbm [thread:$0]  %s44_s17, 256, %s129_s2, [#allocation4]  }
  0x91   :  { %98 = dma.done.wait [#allocation4], 256  }
  0x92   :  { %99 = vsyncadd [#allocation4], 4294967040 }
  0x93   :  { %50 = vsyncpa [#allocation3], 1 }
  0x94   :  { %51 = vsyncpa [#allocation4], 1 }

</bundles_post_ra>
